<compile_context>
chip_gen: v7x
topology: tpu7x:2x2x1
jax: 0.10.0
libtpu: 0.0.40
codegen_flags: <defaults>
</compile_context>

<pallas_src>
import functools

import jax
import jax.numpy as jnp
from jax.experimental import pallas as pl
from jax.experimental.pallas import tpu as pltpu


def _cbam_kernel(x_ref, w1t_ref, w2t_ref, cm_ref, wsa_ref, out_ref,
                 pad_ref, sa_ref, *, k, width, a0, pf):
    """B batch images per grid step.

    x_ref   : (B, C, HW)      VMEM  input tile, HW = H*W flattened (lane-dense)
    w1t_ref : (C, Cr, 1)      VMEM  first 1x1 conv, transposed: w1t[c] = w1[:, c]
    w2t_ref : (Cr, C, 1)      VMEM  second 1x1 conv, transposed: w2t[r] = w2[:, r]
    cm_ref  : (k, HW)         VMEM  column-validity mask per horizontal tap offset
    wsa_ref : (2, k*k)        SMEM  spatial-conv tap weights [avg-chan, max-chan]
    out_ref : (B, C, HW)      VMEM  output tile
    pad_ref : (2B, LW)        VMEM  flat zero-bordered avg/max maps (sublane-packed)
    sa_ref  : (B, HW)         VMEM  spatial-attention map
    """
    B, C, HW = x_ref.shape
    Cr = w1t_ref.shape[1]
    p = k // 2

    x = x_ref[...]                                           # (B, C, HW) f32

    # ---------------- Channel attention (VPU only, no MXU on the serial chain) ----
    avg_c = jnp.mean(x, axis=2, keepdims=True)               # (B, C, 1) AdaptiveAvgPool2d(1)
    max_c = jnp.max(x, axis=2, keepdims=True)                # (B, C, 1) AdaptiveMaxPool2d(1)
    sel = jax.lax.broadcasted_iota(jnp.int32, (B, C, 2), 2)
    pooled = jnp.where(sel == 0, avg_c, max_c)               # (B, C, 2): [avg | max] lanes

    # Shared MLP unrolled over the tiny C / Cr dims (broadcast FMAs).
    h = pooled[:, 0:1, :] * w1t_ref[0][None]                 # (B, Cr, 2)
    for c in range(1, C):
        h = h + pooled[:, c:c + 1, :] * w1t_ref[c][None]
    h = jnp.maximum(h, 0.0)                                  # ReLU (Dropout2d p=0.0 == id)
    o = h[:, 0:1, :] * w2t_ref[0][None]                      # (B, C, 2)
    for r in range(1, Cr):
        o = o + h[:, r:r + 1, :] * w2t_ref[r][None]
    ca = jax.nn.sigmoid(jnp.sum(o, axis=2, keepdims=True))   # (B, C, 1) sigmoid(avg+max)

    x_ca = x * ca                                            # (B, C, HW) lane-broadcast

    # ---------------- Spatial attention ----------------
    avg3 = jnp.mean(x_ca, axis=1, keepdims=True)             # (B, 1, HW) mean over channels
    max3 = jnp.max(x_ca, axis=1, keepdims=True)              # (B, 1, HW) max over channels

    # Flat zero-bordered scratch: rows [0, B) = avg plane, rows [B, 2B) = max plane.
    # Zero ONLY the read border; interior (128-aligned base -> unmasked stores)
    # is fully overwritten by the per-image packing stores below.
    if pf > 0:
        pad_ref[:, a0 - pf:a0] = jnp.zeros((2 * B, pf), jnp.float32)
        pad_ref[:, a0 + HW:a0 + HW + pf] = jnp.zeros((2 * B, pf), jnp.float32)
    for b in range(B):                                       # pack B images onto sublanes
        pad_ref[b:b + 1, a0:a0 + HW] = avg3[b]
        pad_ref[B + b:B + b + 1, a0:a0 + HW] = max3[b]

    # KxK "SAME" conv via static flat shifts on sublane-packed (B, HW) slabs.
    # Taps are grouped by column offset j so the column-wrap validity mask is
    # applied once per group (k-1 vector muls total, none for the center column).
    acc0 = jnp.zeros((B, HW), jnp.float32)
    acc1 = jnp.zeros((B, HW), jnp.float32)
    for j in range(k):
        dx = j - p
        g = None
        for i in range(k):
            st = a0 + (i - p) * width + dx                   # static lane offset
            t = i * k + j
            c_ij = (wsa_ref[0, t] * pad_ref[0:B, st:st + HW] +
                    wsa_ref[1, t] * pad_ref[B:2 * B, st:st + HW])
            g = c_ij if g is None else g + c_ij
        if dx != 0:
            g = g * cm_ref[j:j + 1, :]                       # column-validity mask
        if j % 2 == 0:
            acc0 = acc0 + g
        else:
            acc1 = acc1 + g

    sa_ref[...] = jax.nn.sigmoid(acc0 + acc1)                # (B, HW)

    # Modulate and store, lane-dense, one (C, HW) slab per image.
    for b in range(B):
        out_ref[b] = (x_ca[b] * sa_ref[b:b + 1, :]).astype(out_ref.dtype)


def _pick_batch(n, c, hw):
    """Largest B that divides N, fills sublanes (<= 8), and keeps the per-step
    input tile small enough that double-buffered in+out tiles plus in-kernel
    temps stay well inside the 32 MiB scoped-VMEM default (safe on v7x 64 MiB)."""
    budget = 2 * 1024 * 1024                                  # input-tile bytes target
    max_b = max(1, budget // max(1, c * hw * 4))
    b = int(min(n, 8, max_b))
    while n % b:
        b -= 1
    return b


@functools.partial(jax.jit, static_argnames=("sa_kernel_size",))
def cbam_forward(x_nchw, w1, w2, w_sa, *, sa_kernel_size):
    """CBAM forward. x_nchw: (N, C, H, W) f32; w1: (C//r, C); w2: (C, C//r);
    w_sa: (2, k, k). Returns (N, C, H, W)."""
    N, C, H, W = x_nchw.shape
    Cr = w1.shape[0]
    k = sa_kernel_size
    p = k // 2
    HW = H * W
    PF = p * W + p                                            # flat border width
    A0 = ((PF + 127) // 128) * 128 if PF > 0 else 0           # 128-aligned interior base
    LW = A0 + HW + PF

    B = _pick_batch(N, C, HW)

    x_flat = x_nchw.reshape(N, C, HW)                         # free, contiguous reshape
    w1t = jnp.transpose(w1)[:, :, None]                       # (C, Cr, 1)
    w2t = jnp.transpose(w2)[:, :, None]                       # (Cr, C, 1)
    wsa_flat = w_sa.reshape(2, k * k)                         # tap weights -> SMEM scalars

    # k column-validity masks (one per horizontal tap offset), grid-invariant,
    # tiny (k*HW floats) -- replaces the old 2*k*k weight-x-mask planes.
    xx = jnp.arange(HW, dtype=jnp.int32) % W
    col_masks = jnp.stack(
        [((xx + (j - p) >= 0) & (xx + (j - p) < W)) for j in range(k)],
        axis=0).astype(jnp.float32)                           # (k, HW)

    kernel = functools.partial(_cbam_kernel, k=k, width=W, a0=A0, pf=PF)

    out_flat = pl.pallas_call(
        kernel,
        out_shape=jax.ShapeDtypeStruct((N, C, HW), x_flat.dtype),
        grid_spec=pltpu.PrefetchScalarGridSpec(
            num_scalar_prefetch=0,
            grid=(N // B,),
            in_specs=[
                pl.BlockSpec((B, C, HW), lambda n: (n, 0, 0)),
                pl.BlockSpec((C, Cr, 1), lambda n: (0, 0, 0)),
                pl.BlockSpec((Cr, C, 1), lambda n: (0, 0, 0)),
                pl.BlockSpec((k, HW), lambda n: (0, 0)),
                pl.BlockSpec(memory_space=pltpu.MemorySpace.SMEM),
            ],
            out_specs=pl.BlockSpec((B, C, HW), lambda n: (n, 0, 0)),
            scratch_shapes=[
                pltpu.VMEM((2 * B, LW), jnp.float32),
                pltpu.VMEM((B, HW), jnp.float32),
            ],
        ),
        compiler_params=pltpu.CompilerParams(
            dimension_semantics=("parallel",),
            vmem_limit_bytes=32 * 1024 * 1024,
        ),
    )(x_flat, w1t, w2t, col_masks, wsa_flat)

    return out_flat.reshape(N, C, H, W)                       # free reshape back


def cbam_reference(x, w1, w2, w_sa):
    """Pure-JAX reference matching the PyTorch forward (NCHW, full f32 precision).
    w1: (C//r, C), w2: (C, C//r) in PyTorch (out, in) orientation."""
    hi = jax.lax.Precision.HIGHEST
    avg_c = jnp.mean(x, axis=(2, 3))                          # (N, C)
    max_c = jnp.max(x, axis=(2, 3))                           # (N, C)

    def mlp(v):
        h = jnp.maximum(jnp.matmul(v, w1.T, precision=hi), 0.0)
        return jnp.matmul(h, w2.T, precision=hi)

    ca = jax.nn.sigmoid(mlp(avg_c) + mlp(max_c))[:, :, None, None]
    x_ca = x * ca

    avg_sp = jnp.mean(x_ca, axis=1, keepdims=True)
    max_sp = jnp.max(x_ca, axis=1, keepdims=True)
    sp = jnp.concatenate([avg_sp, max_sp], axis=1)            # (N, 2, H, W)
    conv = jax.lax.conv_general_dilated(
        sp, w_sa[None], window_strides=(1, 1), padding="SAME",
        dimension_numbers=("NCHW", "OIHW", "NCHW"), precision=hi)
    sa = jax.nn.sigmoid(conv)
    return x_ca * sa


if __name__ == "__main__":
    key = jax.random.PRNGKey(0)
    N, C, H, W = 2, 4, 16, 16
    ca_reduction = 2
    sa_kernel_size = 3
    Cr = C // ca_reduction

    k1, k2, k3, k4 = jax.random.split(key, 4)
    x = jax.random.normal(k1, (N, C, H, W), jnp.float32)
    # Deterministic synthetic parameters (shapes follow the module __init__,
    # PyTorch Conv2d (out, in) orientation with the 1x1 / bias-free convs squeezed).
    w1 = jax.random.normal(k2, (Cr, C), jnp.float32) * 0.5       # Conv2d(C, C//r, 1) weight
    w2 = jax.random.normal(k3, (C, Cr), jnp.float32) * 0.5       # Conv2d(C//r, C, 1) weight
    w_sa = jax.random.normal(k4, (2, sa_kernel_size, sa_kernel_size), jnp.float32) * 0.3

    out = cbam_forward(x, w1, w2, w_sa, sa_kernel_size=sa_kernel_size)
    out = jax.block_until_ready(out)

    ref = cbam_reference(x, w1, w2, w_sa)
    assert out.shape == (N, C, H, W)
    assert jnp.allclose(out, ref, atol=1e-5, rtol=1e-5), float(jnp.max(jnp.abs(out - ref)))

    print("KERNEL_OK")
</pallas_src>

<mosaic_0001>
module attributes {stable_mosaic.version = 11 : i64} {
  func.func @_cbam_kernel(%arg0: i32, %arg1: memref<2x4x256xf32, #tpu.memory_space<vmem>>, %arg2: memref<4x2x1xf32, #tpu.memory_space<vmem>>, %arg3: memref<2x4x1xf32, #tpu.memory_space<vmem>>, %arg4: memref<3x256xf32, #tpu.memory_space<vmem>>, %arg5: memref<2x9xf32, #tpu.memory_space<smem>>, %arg6: memref<2x4x256xf32, #tpu.memory_space<vmem>>, %arg7: memref<4x401xf32, #tpu.memory_space<vmem>>, %arg8: memref<2x256xf32, #tpu.memory_space<vmem>>) attributes {dimension_semantics = [#tpu.dimension_semantics<parallel>], iteration_bounds = array<i64: 1>, scalar_prefetch = 0 : i64, scratch_operands = 2 : i64, tpu.core_type = #tpu.core_type<tc>, window_params = [{transform_indices = @transform_0, window_bounds = array<i64: 2, 4, 256>}, {pipeline_mode = #tpu.pipeline_mode<synchronous>, transform_indices = @transform_1, window_bounds = array<i64: 4, 2, 1>}, {pipeline_mode = #tpu.pipeline_mode<synchronous>, transform_indices = @transform_2, window_bounds = array<i64: 2, 4, 1>}, {pipeline_mode = #tpu.pipeline_mode<synchronous>, transform_indices = @transform_3, window_bounds = array<i64: 3, 256>}, {transform_indices = @transform_4, window_bounds = array<i64: 2, 9>}, {transform_indices = @transform_5, window_bounds = array<i64: 2, 4, 256>}]} {
    %c0 = arith.constant 0 : index
    %c0_0 = arith.constant 0 : index
    %c0_1 = arith.constant 0 : index
    %0 = vector.load %arg1[%c0, %c0_0, %c0_1] : memref<2x4x256xf32, #tpu.memory_space<vmem>>, vector<2x4x256xf32>
    %cst = arith.constant dense<0.000000e+00> : vector<2x4xf32>
    %1 = vector.multi_reduction <add>, %0, %cst [2] : vector<2x4x256xf32> to vector<2x4xf32>
    %2 = vector.shape_cast %1 : vector<2x4xf32> to vector<2x4x1xf32>
    %cst_2 = arith.constant 2.560000e+02 : f32
    %3 = vector.broadcast %cst_2 : f32 to vector<2x4x1xf32>
    %4 = arith.divf %2, %3 : vector<2x4x1xf32>
    %cst_3 = arith.constant dense<0xFF800000> : vector<2x4xf32>
    %5 = vector.multi_reduction <maximumf>, %0, %cst_3 [2] : vector<2x4x256xf32> to vector<2x4xf32>
    %6 = vector.shape_cast %5 : vector<2x4xf32> to vector<2x4x1xf32>
    %7 = tpu.iota {dimensions = array<i32: 2>} : vector<2x4x2xi32>
    %c0_i32 = arith.constant 0 : i32
    %8 = vector.broadcast %c0_i32 : i32 to vector<2x4x2xi32>
    %9 = arith.cmpi eq, %7, %8 : vector<2x4x2xi32>
    %10 = vector.shape_cast %4 : vector<2x4x1xf32> to vector<2x4x1xf32>
    %11 = vector.broadcast %10 : vector<2x4x1xf32> to vector<2x4x2xf32>
    %12 = vector.shape_cast %6 : vector<2x4x1xf32> to vector<2x4x1xf32>
    %13 = vector.broadcast %12 : vector<2x4x1xf32> to vector<2x4x2xf32>
    %14 = arith.select %9, %11, %13 : vector<2x4x2xi1>, vector<2x4x2xf32>
    %15 = vector.extract_strided_slice %14 {offsets = [0, 0, 0], sizes = [2, 1, 2], strides = [1, 1, 1]} : vector<2x4x2xf32> to vector<2x1x2xf32>
    %c0_4 = arith.constant 0 : index
    %c0_5 = arith.constant 0 : index
    %c0_6 = arith.constant 0 : index
    %16 = vector.load %arg2[%c0_4, %c0_5, %c0_6] : memref<4x2x1xf32, #tpu.memory_space<vmem>>, vector<1x2x1xf32>
    %17 = vector.shape_cast %16 : vector<1x2x1xf32> to vector<2x1xf32>
    %18 = vector.shape_cast %17 : vector<2x1xf32> to vector<1x2x1xf32>
    %19 = vector.broadcast %15 : vector<2x1x2xf32> to vector<2x2x2xf32>
    %20 = vector.broadcast %18 : vector<1x2x1xf32> to vector<2x2x2xf32>
    %21 = arith.mulf %19, %20 : vector<2x2x2xf32>
    %22 = vector.extract_strided_slice %14 {offsets = [0, 1, 0], sizes = [2, 1, 2], strides = [1, 1, 1]} : vector<2x4x2xf32> to vector<2x1x2xf32>
    %c1 = arith.constant 1 : index
    %c0_7 = arith.constant 0 : index
    %c0_8 = arith.constant 0 : index
    %23 = vector.load %arg2[%c1, %c0_7, %c0_8] : memref<4x2x1xf32, #tpu.memory_space<vmem>>, vector<1x2x1xf32>
    %24 = vector.shape_cast %23 : vector<1x2x1xf32> to vector<2x1xf32>
    %25 = vector.shape_cast %24 : vector<2x1xf32> to vector<1x2x1xf32>
    %26 = vector.broadcast %22 : vector<2x1x2xf32> to vector<2x2x2xf32>
    %27 = vector.broadcast %25 : vector<1x2x1xf32> to vector<2x2x2xf32>
    %28 = arith.mulf %26, %27 : vector<2x2x2xf32>
    %29 = arith.addf %21, %28 : vector<2x2x2xf32>
    %30 = vector.extract_strided_slice %14 {offsets = [0, 2, 0], sizes = [2, 1, 2], strides = [1, 1, 1]} : vector<2x4x2xf32> to vector<2x1x2xf32>
    %c2 = arith.constant 2 : index
    %c0_9 = arith.constant 0 : index
    %c0_10 = arith.constant 0 : index
    %31 = vector.load %arg2[%c2, %c0_9, %c0_10] : memref<4x2x1xf32, #tpu.memory_space<vmem>>, vector<1x2x1xf32>
    %32 = vector.shape_cast %31 : vector<1x2x1xf32> to vector<2x1xf32>
    %33 = vector.shape_cast %32 : vector<2x1xf32> to vector<1x2x1xf32>
    %34 = vector.broadcast %30 : vector<2x1x2xf32> to vector<2x2x2xf32>
    %35 = vector.broadcast %33 : vector<1x2x1xf32> to vector<2x2x2xf32>
    %36 = arith.mulf %34, %35 : vector<2x2x2xf32>
    %37 = arith.addf %29, %36 : vector<2x2x2xf32>
    %38 = vector.extract_strided_slice %14 {offsets = [0, 3, 0], sizes = [2, 1, 2], strides = [1, 1, 1]} : vector<2x4x2xf32> to vector<2x1x2xf32>
    %c3 = arith.constant 3 : index
    %c0_11 = arith.constant 0 : index
    %c0_12 = arith.constant 0 : index
    %39 = vector.load %arg2[%c3, %c0_11, %c0_12] : memref<4x2x1xf32, #tpu.memory_space<vmem>>, vector<1x2x1xf32>
    %40 = vector.shape_cast %39 : vector<1x2x1xf32> to vector<2x1xf32>
    %41 = vector.shape_cast %40 : vector<2x1xf32> to vector<1x2x1xf32>
    %42 = vector.broadcast %38 : vector<2x1x2xf32> to vector<2x2x2xf32>
    %43 = vector.broadcast %41 : vector<1x2x1xf32> to vector<2x2x2xf32>
    %44 = arith.mulf %42, %43 : vector<2x2x2xf32>
    %45 = arith.addf %37, %44 : vector<2x2x2xf32>
    %cst_13 = arith.constant 0.000000e+00 : f32
    %46 = vector.broadcast %cst_13 : f32 to vector<2x2x2xf32>
    %47 = arith.maximumf %45, %46 : vector<2x2x2xf32>
    %48 = vector.extract_strided_slice %47 {offsets = [0, 0, 0], sizes = [2, 1, 2], strides = [1, 1, 1]} : vector<2x2x2xf32> to vector<2x1x2xf32>
    %c0_14 = arith.constant 0 : index
    %c0_15 = arith.constant 0 : index
    %c0_16 = arith.constant 0 : index
    %49 = vector.load %arg3[%c0_14, %c0_15, %c0_16] : memref<2x4x1xf32, #tpu.memory_space<vmem>>, vector<1x4x1xf32>
    %50 = vector.shape_cast %49 : vector<1x4x1xf32> to vector<4x1xf32>
    %51 = vector.shape_cast %50 : vector<4x1xf32> to vector<1x4x1xf32>
    %52 = vector.broadcast %48 : vector<2x1x2xf32> to vector<2x4x2xf32>
    %53 = vector.broadcast %51 : vector<1x4x1xf32> to vector<2x4x2xf32>
    %54 = arith.mulf %52, %53 : vector<2x4x2xf32>
    %55 = vector.extract_strided_slice %47 {offsets = [0, 1, 0], sizes = [2, 1, 2], strides = [1, 1, 1]} : vector<2x2x2xf32> to vector<2x1x2xf32>
    %c1_17 = arith.constant 1 : index
    %c0_18 = arith.constant 0 : index
    %c0_19 = arith.constant 0 : index
    %56 = vector.load %arg3[%c1_17, %c0_18, %c0_19] : memref<2x4x1xf32, #tpu.memory_space<vmem>>, vector<1x4x1xf32>
    %57 = vector.shape_cast %56 : vector<1x4x1xf32> to vector<4x1xf32>
    %58 = vector.shape_cast %57 : vector<4x1xf32> to vector<1x4x1xf32>
    %59 = vector.broadcast %55 : vector<2x1x2xf32> to vector<2x4x2xf32>
    %60 = vector.broadcast %58 : vector<1x4x1xf32> to vector<2x4x2xf32>
    %61 = arith.mulf %59, %60 : vector<2x4x2xf32>
    %62 = arith.addf %54, %61 : vector<2x4x2xf32>
    %cst_20 = arith.constant dense<0.000000e+00> : vector<2x4xf32>
    %63 = vector.multi_reduction <add>, %62, %cst_20 [2] : vector<2x4x2xf32> to vector<2x4xf32>
    %64 = vector.shape_cast %63 : vector<2x4xf32> to vector<2x4x1xf32>
    %65 = arith.negf %64 : vector<2x4x1xf32>
    %66 = math.exp %65 : vector<2x4x1xf32>
    %cst_21 = arith.constant 1.000000e+00 : f32
    %67 = vector.broadcast %cst_21 : f32 to vector<2x4x1xf32>
    %68 = arith.addf %67, %66 : vector<2x4x1xf32>
    %69 = arith.divf %67, %68 : vector<2x4x1xf32>
    %70 = vector.broadcast %69 : vector<2x4x1xf32> to vector<2x4x256xf32>
    %71 = arith.mulf %0, %70 : vector<2x4x256xf32>
    %cst_22 = arith.constant dense<0.000000e+00> : vector<2x256xf32>
    %72 = vector.multi_reduction <add>, %71, %cst_22 [1] : vector<2x4x256xf32> to vector<2x256xf32>
    %73 = vector.shape_cast %72 : vector<2x256xf32> to vector<2x1x256xf32>
    %cst_23 = arith.constant 4.000000e+00 : f32
    %74 = vector.broadcast %cst_23 : f32 to vector<2x1x256xf32>
    %75 = arith.divf %73, %74 : vector<2x1x256xf32>
    %cst_24 = arith.constant dense<0xFF800000> : vector<2x256xf32>
    %76 = vector.multi_reduction <maximumf>, %71, %cst_24 [1] : vector<2x4x256xf32> to vector<2x256xf32>
    %77 = vector.shape_cast %76 : vector<2x256xf32> to vector<2x1x256xf32>
    %cst_25 = arith.constant 0.000000e+00 : f32
    %78 = vector.broadcast %cst_25 : f32 to vector<4x17xf32>
    %c0_26 = arith.constant 0 : index
    %c111 = arith.constant 111 : index
    %79 = vector.load %arg7[%c0_26, %c111] : memref<4x401xf32, #tpu.memory_space<vmem>>, vector<4x17xf32>
    tpu.vector_store %arg7[%c0_26, %c111], %78 {strides = array<i32>} : memref<4x401xf32, #tpu.memory_space<vmem>>, vector<4x17xf32>,
    %cst_27 = arith.constant 0.000000e+00 : f32
    %80 = vector.broadcast %cst_27 : f32 to vector<4x17xf32>
    %c0_28 = arith.constant 0 : index
    %c384 = arith.constant 384 : index
    %81 = vector.load %arg7[%c0_28, %c384] : memref<4x401xf32, #tpu.memory_space<vmem>>, vector<4x17xf32>
    tpu.vector_store %arg7[%c0_28, %c384], %80 {strides = array<i32>} : memref<4x401xf32, #tpu.memory_space<vmem>>, vector<4x17xf32>,
    %82 = vector.extract_strided_slice %75 {offsets = [0, 0, 0], sizes = [1, 1, 256], strides = [1, 1, 1]} : vector<2x1x256xf32> to vector<1x1x256xf32>
    %83 = vector.shape_cast %82 : vector<1x1x256xf32> to vector<1x256xf32>
    %c0_29 = arith.constant 0 : index
    %c128 = arith.constant 128 : index
    %84 = vector.load %arg7[%c0_29, %c128] : memref<4x401xf32, #tpu.memory_space<vmem>>, vector<1x256xf32>
    tpu.vector_store %arg7[%c0_29, %c128], %83 {strides = array<i32>} : memref<4x401xf32, #tpu.memory_space<vmem>>, vector<1x256xf32>,
    %85 = vector.extract_strided_slice %77 {offsets = [0, 0, 0], sizes = [1, 1, 256], strides = [1, 1, 1]} : vector<2x1x256xf32> to vector<1x1x256xf32>
    %86 = vector.shape_cast %85 : vector<1x1x256xf32> to vector<1x256xf32>
    %c2_30 = arith.constant 2 : index
    %c128_31 = arith.constant 128 : index
    %87 = vector.load %arg7[%c2_30, %c128_31] : memref<4x401xf32, #tpu.memory_space<vmem>>, vector<1x256xf32>
    tpu.vector_store %arg7[%c2_30, %c128_31], %86 {strides = array<i32>} : memref<4x401xf32, #tpu.memory_space<vmem>>, vector<1x256xf32>,
    %88 = vector.extract_strided_slice %75 {offsets = [1, 0, 0], sizes = [1, 1, 256], strides = [1, 1, 1]} : vector<2x1x256xf32> to vector<1x1x256xf32>
    %89 = vector.shape_cast %88 : vector<1x1x256xf32> to vector<1x256xf32>
    %c1_32 = arith.constant 1 : index
    %c128_33 = arith.constant 128 : index
    %90 = vector.load %arg7[%c1_32, %c128_33] : memref<4x401xf32, #tpu.memory_space<vmem>>, vector<1x256xf32>
    tpu.vector_store %arg7[%c1_32, %c128_33], %89 {strides = array<i32>} : memref<4x401xf32, #tpu.memory_space<vmem>>, vector<1x256xf32>,
    %91 = vector.extract_strided_slice %77 {offsets = [1, 0, 0], sizes = [1, 1, 256], strides = [1, 1, 1]} : vector<2x1x256xf32> to vector<1x1x256xf32>
    %92 = vector.shape_cast %91 : vector<1x1x256xf32> to vector<1x256xf32>
    %c3_34 = arith.constant 3 : index
    %c128_35 = arith.constant 128 : index
    %93 = vector.load %arg7[%c3_34, %c128_35] : memref<4x401xf32, #tpu.memory_space<vmem>>, vector<1x256xf32>
    tpu.vector_store %arg7[%c3_34, %c128_35], %92 {strides = array<i32>} : memref<4x401xf32, #tpu.memory_space<vmem>>, vector<1x256xf32>,
    %cst_36 = arith.constant 0.000000e+00 : f32
    %94 = vector.broadcast %cst_36 : f32 to vector<2x256xf32>
    %cst_37 = arith.constant 0.000000e+00 : f32
    %95 = vector.broadcast %cst_37 : f32 to vector<2x256xf32>
    %c0_38 = arith.constant 0 : index
    %c0_39 = arith.constant 0 : index
    %96 = memref.load %arg5[%c0_38, %c0_39] : memref<2x9xf32, #tpu.memory_space<smem>>
    %c0_40 = arith.constant 0 : index
    %c111_41 = arith.constant 111 : index
    %97 = vector.load %arg7[%c0_40, %c111_41] : memref<4x401xf32, #tpu.memory_space<vmem>>, vector<2x256xf32>
    %98 = vector.broadcast %96 : f32 to vector<2x256xf32>
    %99 = arith.mulf %98, %97 : vector<2x256xf32>
    %c1_42 = arith.constant 1 : index
    %c0_43 = arith.constant 0 : index
    %100 = memref.load %arg5[%c1_42, %c0_43] : memref<2x9xf32, #tpu.memory_space<smem>>
    %c2_44 = arith.constant 2 : index
    %c111_45 = arith.constant 111 : index
    %101 = vector.load %arg7[%c2_44, %c111_45] : memref<4x401xf32, #tpu.memory_space<vmem>>, vector<2x256xf32>
    %102 = vector.broadcast %100 : f32 to vector<2x256xf32>
    %103 = arith.mulf %102, %101 : vector<2x256xf32>
    %104 = arith.addf %99, %103 : vector<2x256xf32>
    %c0_46 = arith.constant 0 : index
    %c3_47 = arith.constant 3 : index
    %105 = memref.load %arg5[%c0_46, %c3_47] : memref<2x9xf32, #tpu.memory_space<smem>>
    %c0_48 = arith.constant 0 : index
    %c127 = arith.constant 127 : index
    %106 = vector.load %arg7[%c0_48, %c127] : memref<4x401xf32, #tpu.memory_space<vmem>>, vector<2x256xf32>
    %107 = vector.broadcast %105 : f32 to vector<2x256xf32>
    %108 = arith.mulf %107, %106 : vector<2x256xf32>
    %c1_49 = arith.constant 1 : index
    %c3_50 = arith.constant 3 : index
    %109 = memref.load %arg5[%c1_49, %c3_50] : memref<2x9xf32, #tpu.memory_space<smem>>
    %c2_51 = arith.constant 2 : index
    %c127_52 = arith.constant 127 : index
    %110 = vector.load %arg7[%c2_51, %c127_52] : memref<4x401xf32, #tpu.memory_space<vmem>>, vector<2x256xf32>
    %111 = vector.broadcast %109 : f32 to vector<2x256xf32>
    %112 = arith.mulf %111, %110 : vector<2x256xf32>
    %113 = arith.addf %108, %112 : vector<2x256xf32>
    %114 = arith.addf %104, %113 : vector<2x256xf32>
    %c0_53 = arith.constant 0 : index
    %c6 = arith.constant 6 : index
    %115 = memref.load %arg5[%c0_53, %c6] : memref<2x9xf32, #tpu.memory_space<smem>>
    %c0_54 = arith.constant 0 : index
    %c143 = arith.constant 143 : index
    %116 = vector.load %arg7[%c0_54, %c143] : memref<4x401xf32, #tpu.memory_space<vmem>>, vector<2x256xf32>
    %117 = vector.broadcast %115 : f32 to vector<2x256xf32>
    %118 = arith.mulf %117, %116 : vector<2x256xf32>
    %c1_55 = arith.constant 1 : index
    %c6_56 = arith.constant 6 : index
    %119 = memref.load %arg5[%c1_55, %c6_56] : memref<2x9xf32, #tpu.memory_space<smem>>
    %c2_57 = arith.constant 2 : index
    %c143_58 = arith.constant 143 : index
    %120 = vector.load %arg7[%c2_57, %c143_58] : memref<4x401xf32, #tpu.memory_space<vmem>>, vector<2x256xf32>
    %121 = vector.broadcast %119 : f32 to vector<2x256xf32>
    %122 = arith.mulf %121, %120 : vector<2x256xf32>
    %123 = arith.addf %118, %122 : vector<2x256xf32>
    %124 = arith.addf %114, %123 : vector<2x256xf32>
    %c0_59 = arith.constant 0 : index
    %c0_60 = arith.constant 0 : index
    %125 = vector.load %arg4[%c0_59, %c0_60] : memref<3x256xf32, #tpu.memory_space<vmem>>, vector<1x256xf32>
    %126 = vector.broadcast %125 : vector<1x256xf32> to vector<2x256xf32>
    %127 = arith.mulf %124, %126 : vector<2x256xf32>
    %128 = arith.addf %94, %127 : vector<2x256xf32>
    %c0_61 = arith.constant 0 : index
    %c1_62 = arith.constant 1 : index
    %129 = memref.load %arg5[%c0_61, %c1_62] : memref<2x9xf32, #tpu.memory_space<smem>>
    %c0_63 = arith.constant 0 : index
    %c112 = arith.constant 112 : index
    %130 = vector.load %arg7[%c0_63, %c112] : memref<4x401xf32, #tpu.memory_space<vmem>>, vector<2x256xf32>
    %131 = vector.broadcast %129 : f32 to vector<2x256xf32>
    %132 = arith.mulf %131, %130 : vector<2x256xf32>
    %c1_64 = arith.constant 1 : index
    %c1_65 = arith.constant 1 : index
    %133 = memref.load %arg5[%c1_64, %c1_65] : memref<2x9xf32, #tpu.memory_space<smem>>
    %c2_66 = arith.constant 2 : index
    %c112_67 = arith.constant 112 : index
    %134 = vector.load %arg7[%c2_66, %c112_67] : memref<4x401xf32, #tpu.memory_space<vmem>>, vector<2x256xf32>
    %135 = vector.broadcast %133 : f32 to vector<2x256xf32>
    %136 = arith.mulf %135, %134 : vector<2x256xf32>
    %137 = arith.addf %132, %136 : vector<2x256xf32>
    %c0_68 = arith.constant 0 : index
    %c4 = arith.constant 4 : index
    %138 = memref.load %arg5[%c0_68, %c4] : memref<2x9xf32, #tpu.memory_space<smem>>
    %c0_69 = arith.constant 0 : index
    %c128_70 = arith.constant 128 : index
    %139 = vector.load %arg7[%c0_69, %c128_70] : memref<4x401xf32, #tpu.memory_space<vmem>>, vector<2x256xf32>
    %140 = vector.broadcast %138 : f32 to vector<2x256xf32>
    %141 = arith.mulf %140, %139 : vector<2x256xf32>
    %c1_71 = arith.constant 1 : index
    %c4_72 = arith.constant 4 : index
    %142 = memref.load %arg5[%c1_71, %c4_72] : memref<2x9xf32, #tpu.memory_space<smem>>
    %c2_73 = arith.constant 2 : index
    %c128_74 = arith.constant 128 : index
    %143 = vector.load %arg7[%c2_73, %c128_74] : memref<4x401xf32, #tpu.memory_space<vmem>>, vector<2x256xf32>
    %144 = vector.broadcast %142 : f32 to vector<2x256xf32>
    %145 = arith.mulf %144, %143 : vector<2x256xf32>
    %146 = arith.addf %141, %145 : vector<2x256xf32>
    %147 = arith.addf %137, %146 : vector<2x256xf32>
    %c0_75 = arith.constant 0 : index
    %c7 = arith.constant 7 : index
    %148 = memref.load %arg5[%c0_75, %c7] : memref<2x9xf32, #tpu.memory_space<smem>>
    %c0_76 = arith.constant 0 : index
    %c144 = arith.constant 144 : index
    %149 = vector.load %arg7[%c0_76, %c144] : memref<4x401xf32, #tpu.memory_space<vmem>>, vector<2x256xf32>
    %150 = vector.broadcast %148 : f32 to vector<2x256xf32>
    %151 = arith.mulf %150, %149 : vector<2x256xf32>
    %c1_77 = arith.constant 1 : index
    %c7_78 = arith.constant 7 : index
    %152 = memref.load %arg5[%c1_77, %c7_78] : memref<2x9xf32, #tpu.memory_space<smem>>
    %c2_79 = arith.constant 2 : index
    %c144_80 = arith.constant 144 : index
    %153 = vector.load %arg7[%c2_79, %c144_80] : memref<4x401xf32, #tpu.memory_space<vmem>>, vector<2x256xf32>
    %154 = vector.broadcast %152 : f32 to vector<2x256xf32>
    %155 = arith.mulf %154, %153 : vector<2x256xf32>
    %156 = arith.addf %151, %155 : vector<2x256xf32>
    %157 = arith.addf %147, %156 : vector<2x256xf32>
    %158 = arith.addf %95, %157 : vector<2x256xf32>
    %c0_81 = arith.constant 0 : index
    %c2_82 = arith.constant 2 : index
    %159 = memref.load %arg5[%c0_81, %c2_82] : memref<2x9xf32, #tpu.memory_space<smem>>
    %c0_83 = arith.constant 0 : index
    %c113 = arith.constant 113 : index
    %160 = vector.load %arg7[%c0_83, %c113] : memref<4x401xf32, #tpu.memory_space<vmem>>, vector<2x256xf32>
    %161 = vector.broadcast %159 : f32 to vector<2x256xf32>
    %162 = arith.mulf %161, %160 : vector<2x256xf32>
    %c1_84 = arith.constant 1 : index
    %c2_85 = arith.constant 2 : index
    %163 = memref.load %arg5[%c1_84, %c2_85] : memref<2x9xf32, #tpu.memory_space<smem>>
    %c2_86 = arith.constant 2 : index
    %c113_87 = arith.constant 113 : index
    %164 = vector.load %arg7[%c2_86, %c113_87] : memref<4x401xf32, #tpu.memory_space<vmem>>, vector<2x256xf32>
    %165 = vector.broadcast %163 : f32 to vector<2x256xf32>
    %166 = arith.mulf %165, %164 : vector<2x256xf32>
    %167 = arith.addf %162, %166 : vector<2x256xf32>
    %c0_88 = arith.constant 0 : index
    %c5 = arith.constant 5 : index
    %168 = memref.load %arg5[%c0_88, %c5] : memref<2x9xf32, #tpu.memory_space<smem>>
    %c0_89 = arith.constant 0 : index
    %c129 = arith.constant 129 : index
    %169 = vector.load %arg7[%c0_89, %c129] : memref<4x401xf32, #tpu.memory_space<vmem>>, vector<2x256xf32>
    %170 = vector.broadcast %168 : f32 to vector<2x256xf32>
    %171 = arith.mulf %170, %169 : vector<2x256xf32>
    %c1_90 = arith.constant 1 : index
    %c5_91 = arith.constant 5 : index
    %172 = memref.load %arg5[%c1_90, %c5_91] : memref<2x9xf32, #tpu.memory_space<smem>>
    %c2_92 = arith.constant 2 : index
    %c129_93 = arith.constant 129 : index
    %173 = vector.load %arg7[%c2_92, %c129_93] : memref<4x401xf32, #tpu.memory_space<vmem>>, vector<2x256xf32>
    %174 = vector.broadcast %172 : f32 to vector<2x256xf32>
    %175 = arith.mulf %174, %173 : vector<2x256xf32>
    %176 = arith.addf %171, %175 : vector<2x256xf32>
    %177 = arith.addf %167, %176 : vector<2x256xf32>
    %c0_94 = arith.constant 0 : index
    %c8 = arith.constant 8 : index
    %178 = memref.load %arg5[%c0_94, %c8] : memref<2x9xf32, #tpu.memory_space<smem>>
    %c0_95 = arith.constant 0 : index
    %c145 = arith.constant 145 : index
    %179 = vector.load %arg7[%c0_95, %c145] : memref<4x401xf32, #tpu.memory_space<vmem>>, vector<2x256xf32>
    %180 = vector.broadcast %178 : f32 to vector<2x256xf32>
    %181 = arith.mulf %180, %179 : vector<2x256xf32>
    %c1_96 = arith.constant 1 : index
    %c8_97 = arith.constant 8 : index
    %182 = memref.load %arg5[%c1_96, %c8_97] : memref<2x9xf32, #tpu.memory_space<smem>>
    %c2_98 = arith.constant 2 : index
    %c145_99 = arith.constant 145 : index
    %183 = vector.load %arg7[%c2_98, %c145_99] : memref<4x401xf32, #tpu.memory_space<vmem>>, vector<2x256xf32>
    %184 = vector.broadcast %182 : f32 to vector<2x256xf32>
    %185 = arith.mulf %184, %183 : vector<2x256xf32>
    %186 = arith.addf %181, %185 : vector<2x256xf32>
    %187 = arith.addf %177, %186 : vector<2x256xf32>
    %c2_100 = arith.constant 2 : index
    %c0_101 = arith.constant 0 : index
    %188 = vector.load %arg4[%c2_100, %c0_101] : memref<3x256xf32, #tpu.memory_space<vmem>>, vector<1x256xf32>
    %189 = vector.broadcast %188 : vector<1x256xf32> to vector<2x256xf32>
    %190 = arith.mulf %187, %189 : vector<2x256xf32>
    %191 = arith.addf %128, %190 : vector<2x256xf32>
    %192 = arith.addf %191, %158 : vector<2x256xf32>
    %193 = arith.negf %192 : vector<2x256xf32>
    %194 = math.exp %193 : vector<2x256xf32>
    %cst_102 = arith.constant 1.000000e+00 : f32
    %195 = vector.broadcast %cst_102 : f32 to vector<2x256xf32>
    %196 = arith.addf %195, %194 : vector<2x256xf32>
    %197 = arith.divf %195, %196 : vector<2x256xf32>
    %c0_103 = arith.constant 0 : index
    %c0_104 = arith.constant 0 : index
    %198 = vector.load %arg8[%c0_103, %c0_104] : memref<2x256xf32, #tpu.memory_space<vmem>>, vector<2x256xf32>
    tpu.vector_store %arg8[%c0_103, %c0_104], %197 {strides = array<i32>} : memref<2x256xf32, #tpu.memory_space<vmem>>, vector<2x256xf32>,
    %199 = vector.extract_strided_slice %71 {offsets = [0, 0, 0], sizes = [1, 4, 256], strides = [1, 1, 1]} : vector<2x4x256xf32> to vector<1x4x256xf32>
    %200 = vector.shape_cast %199 : vector<1x4x256xf32> to vector<4x256xf32>
    %c0_105 = arith.constant 0 : index
    %c0_106 = arith.constant 0 : index
    %201 = vector.load %arg8[%c0_105, %c0_106] : memref<2x256xf32, #tpu.memory_space<vmem>>, vector<1x256xf32>
    %202 = vector.broadcast %201 : vector<1x256xf32> to vector<4x256xf32>
    %203 = arith.mulf %200, %202 : vector<4x256xf32>
    %c0_107 = arith.constant 0 : index
    %c0_108 = arith.constant 0 : index
    %c0_109 = arith.constant 0 : index
    %204 = vector.load %arg6[%c0_107, %c0_108, %c0_109] : memref<2x4x256xf32, #tpu.memory_space<vmem>>, vector<1x4x256xf32>
    %205 = vector.shape_cast %204 : vector<1x4x256xf32> to vector<4x256xf32>
    %206 = vector.shape_cast %203 : vector<4x256xf32> to vector<1x4x256xf32>
    tpu.vector_store %arg6[%c0_107, %c0_108, %c0_109], %206 {strides = array<i32>} : memref<2x4x256xf32, #tpu.memory_space<vmem>>, vector<1x4x256xf32>,
    %207 = vector.extract_strided_slice %71 {offsets = [1, 0, 0], sizes = [1, 4, 256], strides = [1, 1, 1]} : vector<2x4x256xf32> to vector<1x4x256xf32>
    %208 = vector.shape_cast %207 : vector<1x4x256xf32> to vector<4x256xf32>
    %c1_110 = arith.constant 1 : index
    %c0_111 = arith.constant 0 : index
    %209 = vector.load %arg8[%c1_110, %c0_111] : memref<2x256xf32, #tpu.memory_space<vmem>>, vector<1x256xf32>
    %210 = vector.broadcast %209 : vector<1x256xf32> to vector<4x256xf32>
    %211 = arith.mulf %208, %210 : vector<4x256xf32>
    %c1_112 = arith.constant 1 : index
    %c0_113 = arith.constant 0 : index
    %c0_114 = arith.constant 0 : index
    %212 = vector.load %arg6[%c1_112, %c0_113, %c0_114] : memref<2x4x256xf32, #tpu.memory_space<vmem>>, vector<1x4x256xf32>
    %213 = vector.shape_cast %212 : vector<1x4x256xf32> to vector<4x256xf32>
    %214 = vector.shape_cast %211 : vector<4x256xf32> to vector<1x4x256xf32>
    tpu.vector_store %arg6[%c1_112, %c0_113, %c0_114], %214 {strides = array<i32>} : memref<2x4x256xf32, #tpu.memory_space<vmem>>, vector<1x4x256xf32>,
    return
  }
  func.func @transform_0(%arg0: i32) -> (i32, i32, i32) {
    %c0_i32 = arith.constant 0 : i32
    %c0_i32_0 = arith.constant 0 : i32
    %c0_i32_1 = arith.constant 0 : i32
    return %arg0, %c0_i32, %c0_i32_0 : i32, i32, i32
  }
  func.func @transform_1(%arg0: i32) -> (i32, i32, i32) {
    %c0_i32 = arith.constant 0 : i32
    %c0_i32_0 = arith.constant 0 : i32
    %c0_i32_1 = arith.constant 0 : i32
    %c0_i32_2 = arith.constant 0 : i32
    return %c0_i32, %c0_i32_0, %c0_i32_1 : i32, i32, i32
  }
  func.func @transform_2(%arg0: i32) -> (i32, i32, i32) {
    %c0_i32 = arith.constant 0 : i32
    %c0_i32_0 = arith.constant 0 : i32
    %c0_i32_1 = arith.constant 0 : i32
    %c0_i32_2 = arith.constant 0 : i32
    return %c0_i32, %c0_i32_0, %c0_i32_1 : i32, i32, i32
  }
  func.func @transform_3(%arg0: i32) -> (i32, i32) {
    %c0_i32 = arith.constant 0 : i32
    %c0_i32_0 = arith.constant 0 : i32
    %c0_i32_1 = arith.constant 0 : i32
    return %c0_i32, %c0_i32_0 : i32, i32
  }
  func.func @transform_4(%arg0: i32) -> (i32, i32) {
    %c0_i32 = arith.constant 0 : i32
    %c0_i32_0 = arith.constant 0 : i32
    %c0_i32_1 = arith.constant 0 : i32
    return %c0_i32, %c0_i32_0 : i32, i32
  }
  func.func @transform_5(%arg0: i32) -> (i32, i32, i32) {
    %c0_i32 = arith.constant 0 : i32
    %c0_i32_0 = arith.constant 0 : i32
    %c0_i32_1 = arith.constant 0 : i32
    return %arg0, %c0_i32, %c0_i32_0 : i32, i32, i32
  }
}

</mosaic_0001>

<bundles_post_ra>
// kernel: cbam_forward.1
= control target key start
LH: loop header
LB: loop body
LE: loop exit
PB: predicated region body
PF: predicated region fallthrough
CT: control target
= control target key end

     0   :  { %10 = vsyncpa [#allocation5], 0  ;;  %s1132_s0 = inlined_call_operand.vmem [shape: f32[2,4,256], index: 0, kind: input, shape index: {}]   ;;  %s1133_s1 = inlined_call_operand.vmem [shape: f32[4,2,1], index: 1, kind: input, shape index: {}]   ;;  %s1134_s2 = inlined_call_operand.vmem [shape: f32[2,4,1], index: 2, kind: input, shape index: {}]   ;;  %s1135_s3 = inlined_call_operand.vmem [shape: f32[3,256], index: 3, kind: input, shape index: {}]   ;;  %s1136_s4 = inlined_call_operand.vmem [shape: f32[2,9], index: 4, kind: input, shape index: {}]   ;;  %s1137_s5 = inlined_call_operand.vmem [shape: f32[2,4,256], index: 5, kind: output, shape index: {}]  }
   0x1   :  { %s25_s20 = sshll.u32 %s1136_s4, 4  ;;  %s26_s20 = int_to_ptr.vmem [resolvable:$true] %s25_s20 }
   0x2   :  { %s847_s21 = scalar_lea.vmem %s26_s20, 32  ;;  %p852_p1 = scmp.lt.s32.totalorder %s26_s20, %s26_s20 }
   0x3   :  { %p848_p0 = scmp.ne.s32.totalorder %s26_s20, %s847_s21  ;;  %p853_p2 = scmp.lt.s32.totalorder %s847_s21, %s847_s21 }
   0x5   :  { %p854_p3 = por %p853_p2, %p852_p1 }
   0x7   :  { %p855_p4 = pnand %p854_p3, %p848_p0 }
   0x9   :  { %858 = shalt.err (!%p855_p4)
}
   0xa   :  { %s861_s22 = smov [#allocation4]  }
   0xb   :  { %28 = dma.vmem_to_smem %s26_s20, 32, %s861_s22, [#allocation5]  }
   0xc   :  { %859 = dma.done.wait [#allocation5], 32  }
   0xd   :  { %860 = vsyncadd [#allocation5], 4294967264 }
   0xe   :  { %32 = sfence }
   0xf   :  { %v910_v0 = vld [vmem:[%s1132_s0] sm:$0xff]  ;;  %vm41_vm0 = vcmask 1043456   ;;  %v915_v1 = vld [vmem:[%s1132_s0 + $0x8] sm:$0xff]  ;;  %v862_v6 = vmov 0   ;;  %v65_v23 = vlaneseq  ;;  %vm180_vm2 = vcmask 11264   ;;  %s979_s12 = sld [smem:[#allocation4 + $0x87]] }
  0x10   :  { %v37_v2 = vcombine.high %v910_v0, %v910_v0  ;;  %v55_v3 = vsel %vm41_vm0, %v910_v0, -inf  ;;  %v42_v4 = vsel %vm41_vm0, %v910_v0, 0.0  ;;  %v38_v5 = vcombine.high %v915_v1, %v915_v1  ;;  %828 = vset.pattern.permute.xlu1 %v862_v6  ;;  %827 = vset.pattern.permute.xlu0 %v862_v6  ;;  %v770_v17 = vld [vmem:[%s1133_s1 + $0x2] sm:$0x3]  ;;  %v771_v18 = vld [vmem:[%s1133_s1 + $0x4] sm:$0x3] }
  0x11   :  { %v60_v7 = vsel %vm41_vm0, %v915_v1, -inf  ;;  %v47_v8 = vsel %vm41_vm0, %v915_v1, 0.0  ;;  %v70_v19 = vld [vmem:[%s1133_s1] sm:$0x3]  ;;  %v772_v20 = vld [vmem:[%s1133_s1 + $0x6] sm:$0x3] }
  0x12   :  { %v56_v9 = vsel %vm41_vm0, %v37_v2, -inf  ;;  %v43_v10 = vsel %vm41_vm0, %v37_v2, 0.0  ;;  %v61_v11 = vsel %vm41_vm0, %v38_v5, -inf  ;;  %v48_v12 = vsel %vm41_vm0, %v38_v5, 0.0  ;;  %v145_v21 = vld [vmem:[%s1134_s2] sm:$0xf] }
  0x13   :  { %v57_v13 = vmax.f32 %v55_v3, %v56_v9  ;;  %v44_v14 = vadd.f32 %v43_v10, %v42_v4  ;;  %v62_v15 = vmax.f32 %v60_v7, %v61_v11  ;;  %v49_v16 = vadd.f32 %v48_v12, %v47_v8  ;;  %v773_v22 = vld [vmem:[%s1134_s2 + $0x4] sm:$0xf]  ;;  %s971_s1 = sld [smem:[#allocation4 + $0x85]]  ;;  %s983_s13 = sld [smem:[#allocation4 + $0x7]] }
  0x14   :  { %v66_v26 = vand.u32 127, %v65_v23  ;;  %v953_v27 = vshrl.u32 %v65_v23, 7  ;;  %vm288_vm3 = vcmask 134144   ;;  %s973_s2 = sld [smem:[#allocation4 + $0x5]]  ;;  %s988_s16 = sld [smem:[#allocation4 + $0x86]]  ;;  %vm286_vm4 = vcmask 1044344  }
  0x15   :  { %58 = vmax.xlane.f32.xlu1 %v57_v13  ;;  %45 = vadd.xlane.f32.xlu0 %v44_v14  ;;  %s864_s17 = smov 112   ;;  %s993_s18 = sld [smem:[#allocation4 + $0x88]]  ;;  %vm1045_vm5 = vcmp.lt.s32.totalorder %v65_v23, 256  ;;  %vm423_vm6 = vcmask 916480   ;;  %vm663_vm7 = vcmask 924672   ;;  %vm458_vm8 = vcmask 785408  }
  0x16   :  { %vm67_vm1 = vcmp.eq.s32.totalorder %v66_v26, 0  ;;  %v956_v33 = vsub.s32 1, %v953_v27  ;;  %v959_v34 = vsub.s32 0, %v953_v27  ;;  %v109_v37 = vsub.s32 2, %v953_v27  ;;  %s996_s19 = sld [smem:[#allocation4 + $0x6]]  ;;  %s998_s20 = sld [smem:[#allocation4 + $0x8]] }
  0x17   :  { %v128_v39 = vsub.s32 3, %v953_v27  ;;  %s865_s21 = smov 113   ;;  %s866_s22 = smov 96   ;;  %vm479_vm9 = vcmask 908288   ;;  %vm678_vm10 = vcmask 1031168   ;;  %vm693_vm11 = vcmask 1039360  }
  0x18   :  { %s1051_s23 = sld [smem:[#allocation4 + $0x83]]  ;;  %s1053_s24 = sld [smem:[#allocation4 + $0x80]]  ;;  %vm731_vm12 = vcmask 138240  }
  0x19   :  { %63 = vmax.xlane.f32.xlu1 %v62_v15  ;;  %50 = vadd.xlane.f32.xlu0 %v49_v16  ;;  %s1057_s4 = sld [smem:[#allocation4 + $0x3]]  ;;  %s792_s25 = sld [smem:[#allocation4 + $0x84]] }
  0x1a   :  { %s1063_s0 = sld [smem:[#allocation4]]  ;;  %s791_s26 = sld [smem:[#allocation4 + $0x4]] }
  0x1b   :  { %s799_s29 = sld [smem:[#allocation4 + $0x82]]  ;;  %s788_s6 = sld [smem:[#allocation4 + $0x81]] }
  0x1c   :  { %s798_s30 = sld [smem:[#allocation4 + $0x2]]  ;;  %s1101_s7 = sld [smem:[#allocation4 + $0x1]] }
  0x1d   :  { %s870_s8 = smov 126   ;;  %s871_s9 = smov 127  }
  0x1e   :  { %s873_s10 = smov 17  }
  0x2a   :  { %98 = vperm.xlu1 %828, %v770_v17  }
  0x2e   :  { %117 = vperm.xlu1 %828, %v771_v18   ;;  %v863_v18 = vmov 0.0  }
  0x2f   :  { %81 = vperm.xlu0 %827, %v70_v19   ;;  %289 = vst.msk [vmem:[#allocation2 + $0xc] sm:$0xf] %vm288_vm3, %v863_v18 }
  0x30   :  { %287 = vst.msk [vmem:[#allocation2] sm:$0xf] %vm286_vm4, %v863_v18 }
  0x32   :  { %136 = vperm.xlu1 %828, %v772_v20   ;;  %v591_v20 = vstv %s971_s1 }
  0x36   :  { %156 = vperm.xlu1 %828, %v145_v21   ;;  %v539_v19 = vld [vmem:[#allocation2 + $0xc] sm:$0xc] }
  0x37   :  { %v593_v21 = vmul.f32 %v591_v20, %v539_v19 }
  0x39   :  { %v805_v26 = vrot.slane %v593_v21, 10 }
  0x3a   :  { %173 = vperm.xlu1 %828, %v773_v22   ;;  %v533_v22 = vld [vmem:[#allocation2 + $0xc] sm:$0x3] }
  0xa2   :  { %v59_v24 = vpop.xlane.xlu1 %58  ;;  %v46_v25 = vpop.xlane.xlu0 %45 }
  0xa3   :  { %v53_v28 = vmul.f32 0.00390625, %v46_v25 }
  0xa5   :  { %v68_v35 = vsel %vm67_vm1, %v53_v28, %v59_v24  ;;  %v587_v24 = vstv %s973_s2 }
  0xa6   :  { %v64_v29 = vpop.xlane.xlu1 %63  ;;  %v51_v30 = vpop.xlane.xlu0 %50  ;;  %v91_v40 = vrot.slane %v68_v35, %v956_v33  ;;  %v74_v41 = vrot.slane %v68_v35, %v959_v34  ;;  %v110_v44 = vrot.slane %v68_v35, %v109_v37  ;;  %v129_v51 = vrot.slane %v68_v35, %v128_v39 }
  0xa7   :  { %v54_v31 = vmul.f32 0.00390625, %v51_v30  ;;  %v589_v25 = vmul.f32 %v587_v24, %v533_v22 }
  0xa9   :  { %v69_v32 = vsel %vm67_vm1, %v54_v31, %v64_v29  ;;  %v603_v28 = vadd.f32 %v805_v26, %v589_v25  ;;  %v810_v29 = vld [vmem:[%s1135_s3 + $0x2] ss:$4 sm:$0x3] }
  0xaa   :  { %v99_v36 = vpop.permute.xlu1 %98  ;;  %v95_v38 = vrot.slane %v69_v32, %v956_v33  ;;  %v78_v42 = vrot.slane %v69_v32, %v959_v34  ;;  %v114_v45 = vrot.slane %v69_v32, %v109_v37  ;;  %v133_v52 = vrot.slane %v69_v32, %v128_v39 }
  0xab   :  { %v101_v47 = vmul.f32 %v99_v36, %v91_v40  ;;  %v654_v30 = vrot.slane %v810_v29, %v959_v34  ;;  %v658_v31 = vrot.slane %v810_v29, %v956_v33  ;;  %v540_v32 = vstv %s979_s12  ;;  %v437_v40 = vld [vmem:[#allocation2 + $0xc] sm:$0xc] }
  0xac   :  { %v102_v48 = vmul.f32 %v99_v36, %v95_v38  ;;  %v542_v36 = vmul.f32 %v540_v32, %v539_v19  ;;  %v534_v37 = vstv %s983_s13 }
  0xad   :  { %v659_v35 = vcombine.low %v654_v30, %v658_v31  ;;  %v536_v38 = vmul.f32 %v534_v37, %v533_v22 }
  0xae   :  { %v118_v43 = vpop.permute.xlu1 %117  ;;  %v82_v46 = vpop.permute.xlu0 %81  ;;  %v797_v39 = vrot.slane %v542_v36, 10 }
  0xaf   :  { %v84_v49 = vmul.f32 %v82_v46, %v74_v41  ;;  %v85_v50 = vmul.f32 %v82_v46, %v78_v42  ;;  %v120_v53 = vmul.f32 %v118_v43, %v110_v44  ;;  %v121_v54 = vmul.f32 %v118_v43, %v114_v45  ;;  %v431_v41 = vld [vmem:[#allocation2 + $0xc] sm:$0x3] }
  0xb0   :  { %v438_v42 = vstv %s988_s16  ;;  %v552_v43 = vadd.f32 %v797_v39, %v536_v38  ;;  %v622_v45 = vstv %s993_s18  ;;  %v432_v46 = vstv %s996_s19 }
  0xb1   :  { %v103_v55 = vadd.f32 %v101_v47, %v84_v49  ;;  %v104_v56 = vadd.f32 %v102_v48, %v85_v50  ;;  %v440_v44 = vmul.f32 %v438_v42, %v437_v40  ;;  %v618_v47 = vstv %s998_s20 }
  0xb2   :  { %v137_v57 = vpop.permute.xlu1 %136  ;;  %v624_v48 = vmul.f32 %v622_v45, %v539_v19  ;;  %v434_v49 = vmul.f32 %v432_v46, %v431_v41 }
  0xb3   :  { %v122_v58 = vadd.f32 %v120_v53, %v103_v55  ;;  %v123_v59 = vadd.f32 %v121_v54, %v104_v56  ;;  %v139_v60 = vmul.f32 %v137_v57, %v129_v51  ;;  %v140_v61 = vmul.f32 %v137_v57, %v133_v52 }
  0xb4   :  { %v786_v50 = vrot.slane %v440_v44, 10  ;;  %v620_v51 = vmul.f32 %v618_v47, %v533_v22  ;;  %v809_v52 = vrot.slane %v624_v48, 10 }
  0xb5   :  { %v141_v62 = vadd.f32 %v139_v60, %v122_v58  ;;  %v142_v63 = vadd.f32 %v140_v61, %v123_v59 }
  0xb6   :  { %v157_v2 = vpop.permute.xlu1 %156  ;;  %v450_v53 = vadd.f32 %v786_v50, %v434_v49  ;;  %v634_v54 = vadd.f32 %v809_v52, %v620_v51 }
  0xb7   :  { %v143_v3 = vmax.f32 %v141_v62, 0.0  ;;  %v144_v4 = vmax.f32 %v142_v63, 0.0  ;;  %v867_v62 = vmov 839922192  }
  0xb8   :  { %v202_v63 = vunpack.c.l.s4 %v867_v62 }
  0xb9   :  { %v149_v5 = vrot.slane %v143_v3, %v959_v34  ;;  %v153_v6 = vrot.slane %v144_v4, %v959_v34  ;;  %v166_v7 = vrot.slane %v143_v3, %v956_v33  ;;  %v170_v8 = vrot.slane %v144_v4, %v956_v33 }
  0xba   :  { %v174_v9 = vpop.permute.xlu1 %173  ;;  %v203_v3 = vunpack.c.0.s8 %v202_v63 }
  0xbb   :  { %v159_v10 = vmul.f32 %v157_v2, %v149_v5  ;;  %v160_v11 = vmul.f32 %v157_v2, %v153_v6  ;;  %v176_v12 = vmul.f32 %v174_v9, %v166_v7  ;;  %v177_v13 = vmul.f32 %v174_v9, %v170_v8 }
  0xbc   :  { %v206_v4 = vsub.s32 %v203_v3, %v953_v27  ;;  %v868_v7 = vmov 1966171168  }
  0xbd   :  { %v179_v14 = vadd.f32 %v177_v13, %v160_v11  ;;  %v178_v15 = vadd.f32 %v176_v12, %v159_v10  ;;  %v294_v8 = vunpack.c.l.s4 %v868_v7 }
  0xbf   :  { %v184_v16 = vsel %vm180_vm2, %v179_v14, 0.0  ;;  %v181_v17 = vsel %vm180_vm2, %v178_v15, 0.0  ;;  %v295_v13 = vunpack.c.0.s8 %v294_v8 }
  0xc0   :  { %185 = vadd.xlane.f32.xlu0 %v184_v16  ;;  %182 = vadd.xlane.f32.xlu1 %v181_v17 }
  0xd1   :  { %639 = vrot.lane.b32.xlu1 %v634_v54, %s866_s22 }
  0xd6   :  { %608 = vrot.lane.b32.xlu0 %v603_v28, %s864_s17 }
  0xda   :  { %660 = vrot.lane.b32.xlu0 %v659_v35, %s865_s21 }
  0xde   :  { %557 = vrot.lane.b32.xlu0 %v552_v43, %s866_s22 }
  0xe2   :  { %455 = vrot.lane.b32.xlu0 %v450_v53, %s866_s22 }
 0x14d   :  { %v186_v55 = vpop.xlane.xlu0 %185  ;;  %v183_v56 = vpop.xlane.xlu1 %182 }
 0x14e   :  { %v775_v57 = vmul.f32 -1.442695, %v186_v55  ;;  %v774_v58 = vmul.f32 -1.442695, %v183_v56 }
 0x150   :  { %831 = vpow2.f32 %v775_v57 }
 0x151   :  { %833 = vpow2.f32 %v774_v58 }
 0x15a   :  { %v832_v59 = vpop.eup %831 }
 0x15b   :  { %v834_v60 = vpop.eup %833  ;;  %v194_v61 = vadd.f32 1.0, %v832_v59 }
 0x15c   :  { %v193_v2 = vadd.f32 1.0, %v834_v60 }
 0x15d   :  { %835 = vrcp.f32 %v194_v61 }
 0x15e   :  { %837 = vrcp.f32 %v193_v2 }
 0x167   :  { %v836_v5 = vpop.eup %835 }
 0x168   :  { %v838_v6 = vpop.eup %837  ;;  %v214_v9 = vrot.slane %v836_v5, %v206_v4 }
 0x169   :  { %v207_v10 = vrot.slane %v838_v6, %v206_v4 }
 0x16a   :  { %v1022_v11 = vmul.f32 %v214_v9, %v915_v1 }
 0x16b   :  { %v1025_v12 = vmul.f32 %v207_v10, %v910_v0 }
 0x16c   :  { %v222_v14 = vcombine.high %v1022_v11, %v1022_v11  ;;  %v239_v15 = vsel %vm41_vm0, %v1022_v11, 0.0  ;;  %v272_v16 = vsel %vm41_vm0, %v1022_v11, -inf }
 0x16d   :  { %v240_v17 = vrot.slane %v239_v15, 4  ;;  %v273_v18 = vrot.slane %v272_v16, 4  ;;  %v221_v19 = vcombine.high %v1025_v12, %v1025_v12  ;;  %v225_v1 = vsel %vm41_vm0, %v1025_v12, 0.0 }
 0x16e   :  { %v246_v0 = vsel %vm41_vm0, %v222_v14, 0.0  ;;  %v279_v21 = vsel %vm41_vm0, %v222_v14, -inf  ;;  %v226_v22 = vrot.slane %v225_v1, 4  ;;  %v258_v25 = vsel %vm41_vm0, %v1025_v12, -inf }
 0x16f   :  { %v241_v26 = vadd.f32 %v240_v17, %v239_v15  ;;  %v247_v28 = vrot.slane %v246_v0, 4  ;;  %v274_v29 = vmax.f32 %v272_v16, %v273_v18  ;;  %v280_v30 = vrot.slane %v279_v21, 4 }
 0x170   :  { %v227_v31 = vadd.f32 %v226_v22, %v225_v1  ;;  %v232_v35 = vsel %vm41_vm0, %v221_v19, 0.0  ;;  %v259_v36 = vrot.slane %v258_v25, 4  ;;  %v265_v38 = vsel %vm41_vm0, %v221_v19, -inf }
 0x171   :  { %v242_v39 = vrot.slane %v241_v26, 2  ;;  %v248_v40 = vadd.f32 %v247_v28, %v246_v0  ;;  %v275_v41 = vrot.slane %v274_v29, 2  ;;  %v281_v43 = vmax.f32 %v279_v21, %v280_v30 }
 0x172   :  { %v228_v44 = vrot.slane %v227_v31, 2  ;;  %v233_v48 = vrot.slane %v232_v35, 4  ;;  %v260_v49 = vmax.f32 %v258_v25, %v259_v36  ;;  %v266_v50 = vrot.slane %v265_v38, 4 }
 0x173   :  { %v243_v51 = vadd.f32 %v242_v39, %v241_v26  ;;  %v249_v52 = vrot.slane %v248_v40, 2  ;;  %v276_v53 = vmax.f32 %v274_v29, %v275_v41  ;;  %v282_v54 = vrot.slane %v281_v43, 2 }
 0x174   :  { %v229_v55 = vadd.f32 %v228_v44, %v227_v31  ;;  %v234_v56 = vadd.f32 %v233_v48, %v232_v35  ;;  %v261_v57 = vrot.slane %v260_v49, 2  ;;  %v267_v58 = vmax.f32 %v265_v38, %v266_v50 }
 0x175   :  { %v244_v59 = vrot.slane %v243_v51, 1  ;;  %v250_v60 = vadd.f32 %v249_v52, %v248_v40  ;;  %v277_v61 = vrot.slane %v276_v53, 1  ;;  %v283_v62 = vmax.f32 %v281_v43, %v282_v54 }
 0x176   :  { %v230_v63 = vrot.slane %v229_v55, 1  ;;  %v235_v2 = vrot.slane %v234_v56, 2  ;;  %v262_v3 = vmax.f32 %v260_v49, %v261_v57  ;;  %v268_v4 = vrot.slane %v267_v58, 2 }
 0x177   :  { %v245_v5 = vadd.f32 %v244_v59, %v243_v51  ;;  %v251_v6 = vrot.slane %v250_v60, 1  ;;  %v284_v7 = vrot.slane %v283_v62, 1  ;;  %v298_v14 = vsub.s32 %v295_v13, %v953_v27 }
 0x178   :  { %v236_v8 = vadd.f32 %v235_v2, %v234_v56  ;;  %v263_v9 = vrot.slane %v262_v3, 1  ;;  %v269_v10 = vmax.f32 %v267_v58, %v268_v4  ;;  %v278_v16 = vmax.f32 %v276_v53, %v277_v61 }
 0x179   :  { %v252_v15 = vadd.f32 %v251_v6, %v250_v60  ;;  %v285_v17 = vmax.f32 %v283_v62, %v284_v7  ;;  %v231_v18 = vadd.f32 %v230_v63, %v229_v55  ;;  %v256_v0 = vmul.f32 0.25, %v245_v5 }
 0x17a   :  { %v237_v19 = vrot.slane %v236_v8, 1  ;;  %v270_v1 = vrot.slane %v269_v10, 1  ;;  %v264_v26 = vmax.f32 %v262_v3, %v263_v9  ;;  %v401_v49 = vstv %s1051_s23 }
 0x17b   :  { %v257_v21 = vmul.f32 0.25, %v252_v15  ;;  %v356_v22 = vcombine.low %v278_v16, %v285_v17  ;;  %v254_v13 = vmul.f32 0.25, %v231_v18  ;;  %v383_v50 = vstv %s1053_s24 }
 0x17c   :  { %v238_v25 = vadd.f32 %v237_v19, %v236_v8  ;;  %v271_v28 = vmax.f32 %v269_v10, %v270_v1  ;;  %v397_v53 = vstv %s1057_s4  ;;  %v515_v58 = vstv %s792_s25 }
 0x17d   :  { %v336_v29 = vcombine.low %v256_v0, %v257_v21  ;;  %v363_v30 = vrot.slane %v356_v22, %v298_v14  ;;  %v377_v5 = vstv %s1063_s0 }
 0x17e   :  { %v255_v35 = vmul.f32 0.25, %v238_v25  ;;  %v316_v36 = vcombine.low %v264_v26, %v271_v28 }
 0x17f   :  { %v343_v38 = vrot.slane %v336_v29, %v298_v14  ;;  %v370_v39 = vrot.slane %v363_v30, %v298_v14 }
 0x180   :  { %v292_v40 = vcombine.low %v254_v13, %v255_v35  ;;  %v323_v41 = vrot.slane %v316_v36, %v298_v14 }
 0x181   :  { %v350_v43 = vrot.slane %v343_v38, %v298_v14  ;;  %373 = vst.msk [vmem:[#allocation2 + $0x7] ss:$4 sm:$0x3] %vm1045_vm5, %v370_v39 }
 0x182   :  { %v299_v44 = vrot.slane %v292_v40, %v298_v14  ;;  %v330_v23 = vrot.slane %v323_v41, %v298_v14 }
 0x183   :  { %353 = vst.msk [vmem:[#allocation2 + $0x5] ss:$4 sm:$0x3] %vm1045_vm5, %v350_v43 }
 0x184   :  { %v306_v48 = vrot.slane %v299_v44, %v298_v14  ;;  %333 = vst.msk [vmem:[#allocation2 + $0x6] ss:$4 sm:$0x3] %vm1045_vm5, %v330_v23 }
 0x186   :  { %313 = vst.msk [vmem:[#allocation2 + $0x4] ss:$4 sm:$0x3] %vm1045_vm5, %v306_v48 }
 0x18b   :  { %v538_v51 = vld [vmem:[#allocation2 + $0x4] sm:$0xcc] }
 0x18c   :  { %v382_v52 = vld [vmem:[#allocation2 + $0x8] sm:$0xc]  ;;  %v592_v54 = vmul.f32 %v591_v20, %v538_v51  ;;  %v623_v56 = vmul.f32 %v622_v45, %v538_v51  ;;  %v511_v45 = vstv %s791_s26  ;;  %v541_v17 = vmul.f32 %v540_v32, %v538_v51  ;;  %v381_v19 = vld [vmem:[#allocation2] sm:$0xcc]  ;;  %v609_v51 = vpop.permute.xlu0 %608 }
 0x18d   :  { %v403_v55 = vmul.f32 %v401_v49, %v382_v52  ;;  %v514_v57 = vld [vmem:[#allocation2 + $0x4] sm:$0xcc]  ;;  %v532_v59 = vld [vmem:[#allocation2 + $0x4] sm:$0x33]  ;;  %v385_v61 = vmul.f32 %v383_v50, %v382_v52  ;;  %v384_v21 = vmul.f32 %v383_v50, %v381_v19  ;;  %v402_v13 = vmul.f32 %v401_v49, %v381_v19 }
 0x18e   :  { %v376_v60 = vld [vmem:[#allocation2 + $0x8] sm:$0x3]  ;;  %v588_v62 = vmul.f32 %v587_v24, %v532_v59  ;;  %v804_v63 = vrot.slane %v592_v54, 10  ;;  %v516_v4 = vmul.f32 %v515_v58, %v514_v57  ;;  %v619_v20 = vmul.f32 %v618_v47, %v532_v59  ;;  %v375_v18 = vld [vmem:[#allocation2] sm:$0x33] }
 0x18f   :  { %v399_v2 = vmul.f32 %v397_v53, %v376_v60  ;;  %v782_v3 = vrot.slane %v403_v55, 10  ;;  %v808_v8 = vrot.slane %v623_v56, 10  ;;  %v510_v9 = vld [vmem:[#allocation2 + $0x4] sm:$0x33]  ;;  %v778_v10 = vrot.slane %v385_v61, 10 }
 0x190   :  { %v602_v6 = vadd.f32 %v804_v63, %v588_v62  ;;  %v379_v24 = vmul.f32 %v377_v5, %v376_v60  ;;  %v512_v15 = vmul.f32 %v511_v45, %v510_v9  ;;  %v793_v16 = vrot.slane %v516_v4, 10  ;;  %v465_v47 = vld [vmem:[%s1135_s3] ss:$4 sm:$0x3]  ;;  %v436_v35 = vld [vmem:[#allocation2 + $0x4] sm:$0xcc]  ;;  %v661_v56 = vpop.permute.xlu0 %660 }
 0x191   :  { %v413_v7 = vadd.f32 %v782_v3, %v399_v2  ;;  %v633_v14 = vadd.f32 %v808_v8, %v619_v20  ;;  %v378_v0 = vmul.f32 %v377_v5, %v375_v18  ;;  %v535_v25 = vmul.f32 %v534_v37, %v532_v59  ;;  %v430_v40 = vld [vmem:[#allocation2 + $0x4] sm:$0x33]  ;;  %s869_s3 = smov 111   ;;  %v494_v48 = vld [vmem:[#allocation2] sm:$0xcc] }
 0x192   :  { %606 = vrot.lane.b32.xlu1 %v602_v6, %s864_s17  ;;  %v1081_v1 = vadd.f32 %v778_v10, %v379_v24  ;;  %v521_v22 = vadd.f32 %v793_v16, %v512_v15  ;;  %v796_v26 = vrot.slane %v541_v17, 10  ;;  %v777_v28 = vrot.slane %v384_v21, 10  ;;  %v495_v49 = vld [vmem:[#allocation2 + $0x8] sm:$0xc]  ;;  %v489_v54 = vld [vmem:[#allocation2 + $0x8] sm:$0x3] }
 0x193   :  { %418 = vrot.lane.b32.xlu0 %v413_v7, %s864_s17  ;;  %v470_v32 = vrot.slane %v465_v47, %v959_v34  ;;  %v474_v29 = vrot.slane %v465_v47, %v956_v33  ;;  %v398_v38 = vmul.f32 %v397_v53, %v375_v18  ;;  %v781_v39 = vrot.slane %v402_v13, 10 }
 0x194   :  { %v1092_v30 = vadd.f32 %v777_v28, %v378_v0  ;;  %v551_v31 = vadd.f32 %v796_v26, %v535_v25  ;;  %v439_v37 = vmul.f32 %v438_v42, %v436_v35  ;;  %v433_v43 = vmul.f32 %v432_v46, %v430_v40  ;;  %v640_v42 = vpop.permute.xlu1 %639  ;;  %v488_v46 = vld [vmem:[#allocation2] sm:$0x33]  ;;  %v558_v24 = vpop.permute.xlu0 %557 }
 0x195   :  { %v475_v36 = vcombine.low %v470_v32, %v474_v29  ;;  %v412_v41 = vadd.f32 %v781_v39, %v398_v38  ;;  %v573_v50 = vstv %s799_s29  ;;  %v569_v55 = vstv %s798_s30 }
 0x196   :  { %637 = vrot.lane.b32.xlu1 %v633_v14, %s866_s22  ;;  %v785_v44 = vrot.slane %v439_v37, 10  ;;  %v574_v52 = vmul.f32 %v573_v50, %v494_v48  ;;  %v575_v53 = vmul.f32 %v573_v50, %v495_v49  ;;  %v570_v57 = vmul.f32 %v569_v55, %v488_v46 }
 0x197   :  { %v571_v58 = vmul.f32 %v569_v55, %v489_v54  ;;  %v496_v63 = vstv %s788_s6  ;;  %v662_v2 = vrot.slane %v661_v56, 4  ;;  %v490_v3 = vstv %s1101_s7 }
 0x198   :  { %v449_v23 = vadd.f32 %v785_v44, %v433_v43  ;;  %v800_v59 = vrot.slane %v574_v52, 10  ;;  %v801_v60 = vrot.slane %v575_v53, 10  ;;  %v497_v8 = vmul.f32 %v496_v63, %v494_v48 }
 0x199   :  { %v498_v9 = vmul.f32 %v496_v63, %v495_v49  ;;  %v664_v10 = vsel %vm663_vm7, %v662_v2, %v661_v56  ;;  %v491_v18 = vmul.f32 %v490_v3, %v488_v46  ;;  %v492_v19 = vmul.f32 %v490_v3, %v489_v54 }
 0x19a   :  { %523 = vrot.lane.b32.xlu1 %v521_v22, %s864_s17  ;;  %v584_v6 = vadd.f32 %v800_v59, %v570_v57  ;;  %v585_v7 = vadd.f32 %v801_v60, %v571_v58  ;;  %v789_v0 = vrot.slane %v497_v8, 10 }
 0x19b   :  { %v790_v21 = vrot.slane %v498_v9, 10 }
 0x19c   :  { %v507_v13 = vadd.f32 %v789_v0, %v491_v18 }
 0x19d   :  { %v508_v35 = vadd.f32 %v790_v21, %v492_v19  ;;  %v872_v21 = vmov 1983009808  }
 0x19e   :  { %555 = vrot.lane.b32.xlu1 %v551_v31, %s866_s22  ;;  %v456_v31 = vpop.permute.xlu0 %455 }
 0x1a2   :  { %476 = vrot.lane.b32.xlu1 %v475_v36, %s869_s3 }
 0x1a6   :  { %416 = vrot.lane.b32.xlu1 %v412_v41, %s864_s17 }
 0x1aa   :  { %453 = vrot.lane.b32.xlu1 %v449_v23, %s866_s22 }
 0x204   :  { %v607_v61 = vpop.permute.xlu1 %606 }
 0x205   :  { %v610_v62 = vrot.slane %v607_v61, 4  ;;  %v419_v48 = vpop.permute.xlu0 %418 }
 0x206   :  { %v421_v50 = vrot.slane %v419_v48, 4  ;;  %v428_v55 = vadd.f32 %v419_v48, %v1081_v1 }
 0x207   :  { %v611_v4 = vsel %vm423_vm6, %v610_v62, %v607_v61  ;;  %v612_v5 = vsel %vm423_vm6, %v610_v62, %v609_v51 }
 0x208   :  { %v638_v20 = vpop.permute.xlu1 %637  ;;  %v615_v14 = vadd.f32 %v611_v4, %v584_v6  ;;  %v616_v15 = vadd.f32 %v612_v5, %v585_v7 }
 0x209   :  { %v641_v45 = vrot.slane %v638_v20, 4 }
 0x20b   :  { %v642_v16 = vsel %vm458_vm8, %v641_v45, %v638_v20  ;;  %v643_v17 = vsel %vm458_vm8, %v641_v45, %v640_v42 }
 0x20c   :  { %v646_v47 = vadd.f32 %v642_v16, %v615_v14  ;;  %v524_v22 = vpop.permute.xlu1 %523  ;;  %v647_v25 = vadd.f32 %v643_v17, %v616_v15 }
 0x20d   :  { %v525_v26 = vrot.slane %v524_v22, 4 }
 0x20e   :  { %v668_v28 = vmul.f32 %v662_v2, %v647_v25  ;;  %v667_v32 = vmul.f32 %v664_v10, %v646_v47 }
 0x20f   :  { %v526_v29 = vsel %vm423_vm6, %v525_v26, %v524_v22  ;;  %v530_v37 = vadd.f32 %v525_v26, %v508_v35  ;;  %v714_v22 = vunpack.c.l.s4 %v872_v21 }
 0x210   :  { %673 = vrot.lane.b32.xlu1 %v668_v28, %s870_s8  ;;  %671 = vrot.lane.b32.xlu0 %v667_v32, %s870_s8  ;;  %v556_v36 = vpop.permute.xlu1 %555  ;;  %v529_v39 = vadd.f32 %v526_v29, %v507_v13 }
 0x211   :  { %v559_v38 = vrot.slane %v556_v36, 4  ;;  %v715_v25 = vunpack.c.0.s8 %v714_v22 }
 0x213   :  { %v560_v40 = vsel %vm458_vm8, %v559_v38, %v556_v36  ;;  %v561_v41 = vsel %vm458_vm8, %v559_v38, %v558_v24  ;;  %v718_v26 = vsub.s32 %v715_v25, %v953_v27 }
 0x214   :  { %v564_v43 = vadd.f32 %v560_v40, %v529_v39  ;;  %v477_v44 = vpop.permute.xlu1 %476  ;;  %v565_v23 = vadd.f32 %v561_v41, %v530_v37 }
 0x215   :  { %v478_v60 = vrot.slane %v477_v44, 4 }
 0x216   :  { %688 = vrot.lane.b32.xlu1 %v565_v23, %s871_s9  ;;  %686 = vrot.lane.b32.xlu0 %v564_v43, %s871_s9 }
 0x218   :  { %v417_v49 = vpop.permute.xlu1 %416 }
 0x219   :  { %v420_v51 = vrot.slane %v417_v49, 4 }
 0x21b   :  { %v422_v42 = vsel %vm41_vm0, %v420_v51, %v421_v50 }
 0x21c   :  { %v424_v52 = vsel %vm423_vm6, %v417_v49, %v422_v42  ;;  %v454_v53 = vpop.permute.xlu1 %453 }
 0x21d   :  { %v427_v46 = vadd.f32 %v424_v52, %v1092_v30  ;;  %v457_v54 = vrot.slane %v454_v53, 4  ;;  %v480_v30 = vsel %vm479_vm9, %v478_v60, %v477_v44 }
 0x21f   :  { %v459_v56 = vsel %vm458_vm8, %v457_v54, %v454_v53  ;;  %v460_v57 = vsel %vm458_vm8, %v457_v54, %v456_v31 }
 0x220   :  { %v463_v58 = vadd.f32 %v459_v56, %v427_v46  ;;  %v464_v59 = vadd.f32 %v460_v57, %v428_v55 }
 0x222   :  { %v484_v3 = vmul.f32 %v478_v60, %v464_v59  ;;  %v483_v20 = vmul.f32 %v480_v30, %v463_v58 }
 0x282   :  { %v672_v61 = vpop.permute.xlu0 %671  ;;  %v674_v62 = vpop.permute.xlu1 %673 }
 0x283   :  { %v675_v63 = vrot.slane %v672_v61, 4  ;;  %v676_v2 = vrot.slane %v674_v62, 4  ;;  %v683_v5 = vadd.f32 %v674_v62, %v484_v3 }
 0x285   :  { %v677_v4 = vsel %vm41_vm0, %v675_v63, %v676_v2 }
 0x286   :  { %v679_v6 = vsel %vm678_vm10, %v672_v61, %v677_v4 }
 0x287   :  { %v682_v10 = vadd.f32 %v679_v6, %v483_v20 }
 0x288   :  { %v687_v1 = vpop.permute.xlu0 %686  ;;  %v689_v7 = vpop.permute.xlu1 %688 }
 0x289   :  { %v690_v8 = vrot.slane %v687_v1, 4  ;;  %v691_v9 = vrot.slane %v689_v7, 4  ;;  %v698_v45 = vadd.f32 %v689_v7, %v683_v5 }
 0x28b   :  { %v692_v24 = vsel %vm41_vm0, %v690_v8, %v691_v9  ;;  %v812_v14 = vmul.f32 -1.442695, %v698_v45 }
 0x28c   :  { %v694_v15 = vsel %vm693_vm11, %v687_v1, %v692_v24 }
 0x28d   :  { %v697_v16 = vadd.f32 %v694_v15, %v682_v10  ;;  %839 = vpow2.f32 %v812_v14 }
 0x28f   :  { %v811_v17 = vmul.f32 -1.442695, %v697_v16 }
 0x291   :  { %841 = vpow2.f32 %v811_v17 }
 0x297   :  { %v840_v18 = vpop.eup %839 }
 0x298   :  { %v706_v19 = vadd.f32 1.0, %v840_v18 }
 0x29a   :  { %843 = vrcp.f32 %v706_v19 }
 0x29b   :  { %v842_v47 = vpop.eup %841 }
 0x29c   :  { %v705_v0 = vadd.f32 1.0, %v842_v47 }
 0x29e   :  { %845 = vrcp.f32 %v705_v0 }
 0x2a4   :  { %v844_v28 = vpop.eup %843 }
 0x2a5   :  { %v726_v31 = vrot.slane %v844_v28, %v718_v26 }
 0x2a8   :  { %v846_v32 = vpop.eup %845 }
 0x2a9   :  { %v719_v29 = vrot.slane %v846_v32, %v718_v26 }
 0x2ab   :  { %v727_v13 = vcombine.low %v719_v29, %v726_v31 }
 0x2ad   :  { %728 = vrot.lane.b32.xlu0 %v727_v13, %s873_s10 }
 0x31f   :  { %v729_v35 = vpop.permute.xlu0 %728 }
 0x320   :  { %v730_v36 = vrot.slane %v729_v35, 2 }
 0x322   :  { %v732_v38 = vsel %vm731_vm12, %v729_v35, %v730_v36 }
 0x323   :  { %734 = vst [vmem:[#allocation3] sm:$0xf] %v732_v38 }
 0x32a   :  { %v735_v39 = vld [vmem:[#allocation3] ss:$2 sm:$0x3]  ;;  %v750_v37 = vld [vmem:[#allocation3 + $0x1] ss:$2 sm:$0x3] }
 0x32b   :  { %v740_v40 = vrot.slane %v735_v39, %v959_v34  ;;  %v744_v41 = vrot.slane %v735_v39, %v956_v33  ;;  %v755_v27 = vrot.slane %v750_v37, %v959_v34  ;;  %v759_v43 = vrot.slane %v750_v37, %v956_v33 }
 0x32d   :  { %v745_v44 = vcombine.low %v740_v40, %v744_v41  ;;  %v760_v23 = vcombine.low %v755_v27, %v759_v43 }
 0x32f   :  { %v747_v48 = vmul.f32 %v745_v44, %v1025_v12  ;;  %v762_v49 = vmul.f32 %v760_v23, %v1022_v11 }
 0x331   :  { %748 = vst [vmem:[%s1137_s5] sm:$0xff] %v747_v48  ;;  %813 = vst [vmem:[%s1137_s5 + $0x8] sm:$0xff] %v762_v49 }
 0x332   :  { %769 = vsyncpa [#allocation5], 1 }

</bundles_post_ra>
